<compile_context>
chip_gen: v7x
topology: tpu7x:2x2x1
jax: 0.10.0
libtpu: 0.0.40
codegen_flags: <defaults>
</compile_context>

<pallas_src>
import math

import jax
import jax.numpy as jnp
from jax.experimental import pallas as pl
from jax.experimental.pallas import tpu as pltpu

# Small deterministic problem size consistent with the module.
BATCH = 2
C_IN = 4
T_STEPS = 16      # temporal length
N_NODES = 16      # graph nodes (gso is N x N)
C_OUT = 8


def _graph_conv_kernel(x_ref, m_ref, b_ref, o_ref):
    # x_ref: (B*T, N*C_in)      VMEM
    # m_ref: (N*C_in, N*C_out)  VMEM   (kron(gso.T, weight))
    # b_ref: (1, N*C_out)       VMEM   (bias tiled across nodes)
    # o_ref: (B*T, N*C_out)     VMEM
    acc = jnp.dot(x_ref[...], m_ref[...],
                  preferred_element_type=jnp.float32,
                  precision=jax.lax.Precision.HIGHEST)
    o_ref[...] = acc + b_ref[...]          # one full-vreg lane-dense store


def graph_conv_forward(x, gso, weight, bias):
    """x: (B, C_in, T, N) f32. Returns graph_conv: (B, T, N, C_out) f32."""
    B, c_in, T, N = x.shape
    c_out = weight.shape[1]
    BT = B * T

    # X[b*T + t, n*C_in + i] = x[b, i, t, n]          -> (B*T, N*C_in) = (32, 64)
    x_flat = jnp.transpose(x, (0, 2, 3, 1)).reshape(BT, N * c_in)

    # M[n*C_in + i, h*C_out + c] = gso[h, n] * weight[i, c]
    #   = kron(gso.T, weight)                         -> (N*C_in, N*C_out) = (64, 128)
    m = jnp.kron(gso.T, weight)

    # bias_row[0, h*C_out + c] = bias[c]              -> (1, N*C_out) = (1, 128)
    bias_row = jnp.tile(bias, N).reshape(1, N * c_out)

    out_flat = pl.pallas_call(
        _graph_conv_kernel,
        out_shape=jax.ShapeDtypeStruct((BT, N * c_out), jnp.float32),
        in_specs=[
            pl.BlockSpec(memory_space=pltpu.MemorySpace.VMEM),   # X
            pl.BlockSpec(memory_space=pltpu.MemorySpace.VMEM),   # kron operator
            pl.BlockSpec(memory_space=pltpu.MemorySpace.VMEM),   # tiled bias
        ],
        out_specs=pl.BlockSpec(memory_space=pltpu.MemorySpace.VMEM),
        compiler_params=pltpu.CompilerParams(
            allow_input_fusion=[True, True, True]),
    )(x_flat, m, bias_row)

    # (B*T, N*C_out) -> (B, T, N, C_out): pure reshape, no transpose needed.
    return out_flat.reshape(B, T, N, c_out)


def graph_conv_reference(x, gso, weight, bias):
    """Pure-JAX reference of the PyTorch GraphConv forward."""
    hp = jax.lax.Precision.HIGHEST
    x_p = jnp.transpose(x, (0, 2, 3, 1))                           # (B, T, N, C_in)
    first = jnp.einsum('hi,btij->bthj', gso, x_p, precision=hp)
    second = jnp.einsum('bthi,ij->bthj', first, weight, precision=hp)
    return second + bias


if __name__ == "__main__":
    key = jax.random.PRNGKey(0)
    kx, kg, kw, kb = jax.random.split(key, 4)

    x = jax.random.normal(kx, (BATCH, C_IN, T_STEPS, N_NODES), jnp.float32)
    gso = jax.random.normal(kg, (N_NODES, N_NODES), jnp.float32) * (
        1.0 / math.sqrt(N_NODES))
    weight = jax.random.normal(kw, (C_IN, C_OUT), jnp.float32) * 0.3
    bias = jax.random.normal(kb, (C_OUT,), jnp.float32) * 0.1

    out = graph_conv_forward(x, gso, weight, bias)
    out = jax.block_until_ready(out)

    ref = graph_conv_reference(x, gso, weight, bias)
    assert out.shape == (BATCH, T_STEPS, N_NODES, C_OUT)
    assert jnp.allclose(out, ref, atol=2e-4, rtol=2e-4)

    print("KERNEL_OK")
</pallas_src>

<mosaic_0001>
module attributes {stable_mosaic.version = 11 : i64} {
  func.func @_graph_conv_kernel(%arg0: memref<32x64xf32, #tpu.memory_space<vmem>>, %arg1: memref<64x128xf32, #tpu.memory_space<vmem>>, %arg2: memref<1x128xf32, #tpu.memory_space<vmem>>, %arg3: memref<32x128xf32, #tpu.memory_space<vmem>>) attributes {dimension_semantics = [], scalar_prefetch = 0 : i64, scratch_operands = 0 : i64, tpu.core_type = #tpu.core_type<tc>} {
    %c0 = arith.constant 0 : index
    %c0_0 = arith.constant 0 : index
    %0 = vector.load %arg0[%c0, %c0_0] : memref<32x64xf32, #tpu.memory_space<vmem>>, vector<32x64xf32>
    %c0_1 = arith.constant 0 : index
    %c0_2 = arith.constant 0 : index
    %1 = vector.load %arg1[%c0_1, %c0_2] : memref<64x128xf32, #tpu.memory_space<vmem>>, vector<64x128xf32>
    %cst = arith.constant dense<0.000000e+00> : vector<32x128xf32>
    %2 = tpu.matmul %0, %1, %cst {dimension_numbers = #tpu.dot_dimension_numbers<[1], [0], [0], [1], [0, 0, 1, 1], [], []>, precision = #tpu.contract_precision<fp32>} : vector<32x64xf32>, vector<64x128xf32>, vector<32x128xf32> -> vector<32x128xf32>
    %c0_3 = arith.constant 0 : index
    %c0_4 = arith.constant 0 : index
    %3 = vector.load %arg2[%c0_3, %c0_4] : memref<1x128xf32, #tpu.memory_space<vmem>>, vector<1x128xf32>
    %4 = vector.broadcast %3 : vector<1x128xf32> to vector<32x128xf32>
    %5 = arith.addf %2, %4 : vector<32x128xf32>
    %c0_5 = arith.constant 0 : index
    %c0_6 = arith.constant 0 : index
    %6 = vector.load %arg3[%c0_5, %c0_6] : memref<32x128xf32, #tpu.memory_space<vmem>>, vector<32x128xf32>
    tpu.vector_store %arg3[%c0_5, %c0_6], %5 {strides = array<i32>} : memref<32x128xf32, #tpu.memory_space<vmem>>, vector<32x128xf32>,
    return
  }
}

</mosaic_0001>

<bundles_post_ra>
// kernel: tpu_custom_call.1
= control target key start
LH: loop header
LB: loop body
LE: loop exit
PB: predicated region body
PF: predicated region fallthrough
CT: control target
= control target key end

     0   :  { %8 = vsyncpa [#allocation3], 0  ;;  %s1362_s0 = inlined_call_operand.hbm [shape: f32[32,64], index: 0, kind: input, shape index: {}]   ;;  %s1363_s1 = inlined_call_operand.hbm [shape: f32[64,128], index: 1, kind: input, shape index: {}]   ;;  %s1364_s2 = inlined_call_operand.vmem [shape: f32[1,128], index: 2, kind: input, shape index: {}]   ;;  %s1365_s3 = inlined_call_operand.hbm [shape: f32[32,128], index: 3, kind: output, shape index: {}]  }
   0x1   :  { %9 = vsyncpa [#allocation6], 0 }
   0x2   :  { %10 = vsyncpa [#allocation4], 0  ;;  %s1165_s12 = smov [#allocation2]   ;;  %s1093_s16 = scalar_lea.hbm %s1362_s0, 512 }
   0x3   :  { %s16_s13 = sshll.u32 %s1165_s12, 4  ;;  %p1094_p0 = scmp.ne.s32.totalorder %s1362_s0, %s1093_s16  ;;  %s17_s13 = int_to_ptr.vmem [resolvable:$true] %s16_s13 }
   0x4   :  { %p1097_p1 = scmp.lt.u32.totalorder %s1093_s16, %s1362_s0 }
   0x6   :  { %p1099_p2 = pnand %p1097_p1, %p1094_p0 }
   0x8   :  { %1102 = shalt.err (!%p1099_p2)
}
   0x9   :  { %s1103_s21 = scalar_lea.vmem %s17_s13, 512  ;;  %p1108_p4 = scmp.lt.s32.totalorder %s17_s13, %s17_s13 }
   0xa   :  { %p1104_p3 = scmp.ne.s32.totalorder %s17_s13, %s1103_s21  ;;  %p1109_p5 = scmp.lt.s32.totalorder %s1103_s21, %s1103_s21 }
   0xc   :  { %p1110_p6 = por %p1109_p5, %p1108_p4 }
   0xe   :  { %p1111_p7 = pnand %p1110_p6, %p1104_p3 }
  0x10   :  { %1114 = shalt.err (!%p1111_p7)
}
  0x11   :  { %s1166_s22 = smov 128   ;;  %s1167_s23 = smov 8  }
  0x12   :  { %22 = dma.hbm_to_vmem [thread:$0]  %s1362_s0, 512, %s17_s13, [#allocation3], %s1166_s22, %s1166_s22, %s1167_s23  }
  0x13   :  { %s1168_s26 = smov [#allocation5]   ;;  %s1115_s30 = scalar_lea.hbm %s1363_s1, 1024 }
  0x14   :  { %s28_s27 = sshll.u32 %s1168_s26, 4  ;;  %p1116_p8 = scmp.ne.s32.totalorder %s1363_s1, %s1115_s30  ;;  %s29_s27 = int_to_ptr.vmem [resolvable:$true] %s28_s27 }
  0x15   :  { %p1119_p9 = scmp.lt.u32.totalorder %s1115_s30, %s1363_s1 }
  0x17   :  { %p1121_p10 = pnand %p1119_p9, %p1116_p8 }
  0x19   :  { %1124 = shalt.err (!%p1121_p10)
}
  0x1a   :  { %s1125_s8 = scalar_lea.vmem %s29_s27, 1024  ;;  %p1130_p12 = scmp.lt.s32.totalorder %s29_s27, %s29_s27 }
  0x1b   :  { %p1126_p11 = scmp.ne.s32.totalorder %s29_s27, %s1125_s8  ;;  %p1131_p13 = scmp.lt.s32.totalorder %s1125_s8, %s1125_s8 }
  0x1d   :  { %p1132_p0 = por %p1131_p13, %p1130_p12 }
  0x1f   :  { %p1133_p1 = pnand %p1132_p0, %p1126_p11 }
  0x21   :  { %1136 = shalt.err (!%p1133_p1)
}
  0x22   :  { %34 = dma.hbm_to_vmem [thread:$0]  %s1363_s1, 1024, %s29_s27, [#allocation6], %s1166_s22, %s1166_s22, %s1167_s23  }
  0x23   :  { %1159 = dma.done.wait [#allocation3], 512  }
  0x24   :  { %1160 = vsyncadd [#allocation3], 4294966784 }
  0x25   :  { %1161 = dma.done.wait [#allocation6], 1024  }
  0x26   :  { %1162 = vsyncadd [#allocation6], 4294966272  ;;  %v47_v0 = vld [vmem:[#allocation5] sm:$0xff]  ;;  %v48_v1 = vld [vmem:[#allocation5 + $0x8] sm:$0xff]  ;;  %vm62_vm0 = vcmask 523264   ;;  %s1169_s11 = smov [#allocation7]  }
  0x27   :  { %v49_v2 = vld [vmem:[#allocation5 + $0x10] sm:$0xff]  ;;  %v76_v3 = vand.u32 4294901760, %v47_v0  ;;  %v79_v4 = vand.u32 4294901760, %v48_v1  ;;  %v50_v5 = vld [vmem:[#allocation5 + $0x18] sm:$0xff]  ;;  %v51_v7 = vld [vmem:[#allocation5 + $0x20] sm:$0xff]  ;;  %s750_s12 = sshll.u32 %s1169_s11, 4  ;;  %s751_s12 = int_to_ptr.vmem [resolvable:$true] %s750_s12 }
  0x28   :  { %v82_v6 = vand.u32 4294901760, %v49_v2  ;;  %v52_v8 = vld [vmem:[#allocation5 + $0x28] sm:$0xff]  ;;  %v85_v9 = vand.u32 4294901760, %v50_v5  ;;  %v88_v10 = vand.u32 4294901760, %v51_v7  ;;  %v53_v12 = vld [vmem:[#allocation5 + $0x30] sm:$0xff]  ;;  %v1220_v13 = vld [vmem:[#allocation5 + $0x38] sm:$0xff]  ;;  %p1142_p3 = scmp.lt.s32.totalorder %s751_s12, %s751_s12 }
  0x29   :  { %v91_v11 = vand.u32 4294901760, %v52_v8  ;;  %v43_v14 = vld [vmem:[#allocation2] sm:$0xff]  ;;  %v1222_v15 = vpack.c.bf16 %v79_v4, %v76_v3  ;;  %v94_v16 = vand.u32 4294901760, %v53_v12  ;;  %v44_v18 = vld [vmem:[#allocation2 + $0x8] sm:$0xff]  ;;  %v97_v20 = vand.u32 4294901760, %v1220_v13  ;;  %v45_v46 = vld [vmem:[#allocation2 + $0x10] sm:$0xff] }
  0x2a   :  { %v64_v17 = vsel %vm62_vm0, %v43_v14, 0  ;;  %v1225_v19 = vpack.c.bf16 %v85_v9, %v82_v6  ;;  %v1230_v22 = vsub.f32 %v47_v0, %v76_v3  ;;  %v1236_v24 = vsub.f32 %v48_v1, %v79_v4  ;;  %v46_v52 = vld [vmem:[#allocation2 + $0x18] sm:$0xff] }
  0x2b   :  { %v1228_v21 = vand.u32 4294901760, %v64_v17  ;;  %969 = vmatprep.subr.bf16.mxu1 %v1222_v15  ;;  %1017 = vmatprep.subr.bf16.mxu0 %v1222_v15  ;;  %v1234_v23 = vpack.c.bf16 %v91_v11, %v88_v10  ;;  %v67_v25 = vsel %vm62_vm0, %v44_v18, 0  ;;  %v1239_v26 = vsub.f32 %v49_v2, %v82_v6 }
  0x2c   :  { %971 = vmatpush3.bf16.msra.mxu1 %v1222_v15  ;;  %1019 = vmatpush3.bf16.msra.mxu0 %v1222_v15  ;;  %v191_v28 = vand.u32 4294901760, %v1230_v22  ;;  %v1247_v29 = vand.u32 4294901760, %v67_v25  ;;  %v1249_v30 = vsub.f32 %v50_v5, %v85_v9  ;;  %v198_v31 = vand.u32 4294901760, %v1236_v24 }
  0x2d   :  { %v1244_v27 = vsub.f32 %v64_v17, %v1228_v21  ;;  %973 = vmatprep.subr.bf16.mxu1 %v1225_v19  ;;  %1021 = vmatprep.subr.bf16.mxu0 %v1225_v19  ;;  %v205_v32 = vand.u32 4294901760, %v1239_v26  ;;  %v1255_v33 = vsub.f32 %v51_v7, %v88_v10  ;;  %v1257_v34 = vsub.f32 %v52_v8, %v91_v11 }
  0x2e   :  { %v192_v36 = vsub.f32 %v1230_v22, %v191_v28  ;;  %v1262_v37 = vsub.f32 %v67_v25, %v1247_v29  ;;  %v212_v38 = vand.u32 4294901760, %v1249_v30  ;;  %v199_v39 = vsub.f32 %v1236_v24, %v198_v31 }
  0x2f   :  { %v150_v35 = vand.u32 4294901760, %v1244_v27  ;;  %v206_v40 = vsub.f32 %v1239_v26, %v205_v32  ;;  %v219_v41 = vand.u32 4294901760, %v1255_v33  ;;  %v1275_v47 = vpack.c.bf16 %v97_v20, %v94_v16 }
  0x30   :  { %975 = vmatpush3.bf16.msra.mxu1 %v1225_v19  ;;  %1023 = vmatpush3.bf16.msra.mxu0 %v1225_v19  ;;  %v193_v43 = vand.u32 4294901760, %v192_v36  ;;  %v160_v44 = vand.u32 4294901760, %v1262_v37  ;;  %v213_v45 = vsub.f32 %v1249_v30, %v212_v38  ;;  %v200_v48 = vand.u32 4294901760, %v199_v39 }
  0x31   :  { %v151_v42 = vsub.f32 %v1244_v27, %v150_v35  ;;  %977 = vmatprep.subr.bf16.mxu1 %v1234_v23  ;;  %1025 = vmatprep.subr.bf16.mxu0 %v1234_v23  ;;  %v1032_v50 = vpack.c.bf16 %v198_v31, %v191_v28  ;;  %v226_v51 = vand.u32 4294901760, %v1257_v34  ;;  %v207_v54 = vand.u32 4294901760, %v206_v40 }
  0x32   :  { %918 = vmatprep.mubr.f32.mxu0 %v150_v35  ;;  %v161_v53 = vsub.f32 %v1262_v37, %v160_v44  ;;  %v70_v55 = vsel %vm62_vm0, %v45_v46, 0  ;;  %v1280_v56 = vsub.f32 %v53_v12, %v94_v16  ;;  %v984_v57 = vpack.c.bf16 %v200_v48, %v193_v43 }
  0x33   :  { %v152_v49 = vand.u32 4294901760, %v151_v42  ;;  %v214_v58 = vand.u32 4294901760, %v213_v45  ;;  %v220_v59 = vsub.f32 %v1255_v33, %v219_v41  ;;  %v227_v60 = vsub.f32 %v1257_v34, %v226_v51 }
  0x34   :  { %979 = vmatpush3.bf16.msra.mxu1 %v1234_v23  ;;  %1027 = vmatpush3.bf16.msra.mxu0 %v1234_v23  ;;  %v1288_v61 = vand.u32 4294901760, %v70_v55  ;;  %v233_v62 = vand.u32 4294901760, %v1280_v56  ;;  %v1292_v63 = vsub.f32 %v1220_v13, %v97_v20  ;;  %v73_v0 = vsel %vm62_vm0, %v46_v52, 0 }
  0x35   :  { %981 = vmatprep.subr.bf16.mxu1 %v1275_v47  ;;  %1029 = vmatprep.subr.bf16.mxu0 %v1275_v47  ;;  %v1295_v1 = vand.u32 4294901760, %v73_v0  ;;  %v162_v2 = vand.u32 4294901760, %v161_v53  ;;  %v988_v5 = vpack.c.bf16 %v214_v58, %v207_v54  ;;  %v1036_v6 = vpack.c.bf16 %v212_v38, %v205_v32 }
  0x36   :  { %852 = vmatprep.mubr.f32.mxu1 %v152_v49  ;;  %v1298_v3 = vsub.f32 %v70_v55, %v1288_v61  ;;  %v240_v4 = vand.u32 4294901760, %v1292_v63  ;;  %v221_v7 = vand.u32 4294901760, %v220_v59  ;;  %v228_v9 = vand.u32 4294901760, %v227_v60 }
  0x37   :  { %v1304_v8 = vsub.f32 %v73_v0, %v1295_v1  ;;  %v234_v11 = vsub.f32 %v1280_v56, %v233_v62  ;;  %v1040_v16 = vpack.c.bf16 %v226_v51, %v219_v41  ;;  %v1000_v36 = vpack.c.bf16 %v1236_v24, %v1230_v22 }
  0x38   :  { %983 = vmatpush3.bf16.msra.mxu1 %v1275_v47  ;;  %1031 = vmatpush3.bf16.msra.mxu0 %v1275_v47  ;;  %v170_v10 = vand.u32 4294901760, %v1298_v3  ;;  %v241_v12 = vsub.f32 %v1292_v63, %v240_v4  ;;  %v992_v18 = vpack.c.bf16 %v228_v9, %v221_v7  ;;  %v1044_v35 = vpack.c.bf16 %v240_v4, %v233_v62 }
  0x39   :  { %985 = vmatprep.subr.bf16.mxu1 %v984_v57  ;;  %1033 = vmatprep.subr.bf16.mxu0 %v1032_v50  ;;  %v180_v13 = vand.u32 4294901760, %v1304_v8  ;;  %v235_v25 = vand.u32 4294901760, %v234_v11  ;;  %v1004_v38 = vpack.c.bf16 %v1249_v30, %v1239_v26  ;;  %v1008_v22 = vpack.c.bf16 %v1257_v34, %v1255_v33 }
  0x3a   :  { %v171_v14 = vsub.f32 %v1298_v3, %v170_v10  ;;  %v242_v28 = vand.u32 4294901760, %v241_v12 }
  0x3b   :  { %853 = vmatmul.mubr.f32.vlgmr.msra.gmra.mrb[0].mxu1 %v162_v2  ;;  %919 = vmatmul.mubr.f32.vlgmr.msra.gmra.mrb[0].mxu0 %v160_v44  ;;  %v181_v17 = vsub.f32 %v1304_v8, %v180_v13 }
  0x3c   :  { %987 = vmatpush3.bf16.msra.mxu1 %v984_v57  ;;  %1035 = vmatpush3.bf16.msra.mxu0 %v1032_v50  ;;  %v172_v20 = vand.u32 4294901760, %v171_v14  ;;  %v996_v32 = vpack.c.bf16 %v242_v28, %v235_v25 }
  0x3d   :  { %989 = vmatprep.subr.bf16.mxu1 %v988_v5  ;;  %1037 = vmatprep.subr.bf16.mxu0 %v1036_v6  ;;  %v182_v31 = vand.u32 4294901760, %v181_v17 }
  0x3e   :  { %921 = vmatprep.mubr.f32.mxu0 %v170_v10  ;;  %855 = vmatprep.mubr.f32.mxu1 %v172_v20 }
  0x3f   :  { %922 = vmatmul.mubr.f32.gmra.mrb[2].mxu0 %v180_v13  ;;  %856 = vmatmul.mubr.f32.gmra.mrb[2].mxu1 %v182_v31 }
  0x40   :  { %991 = vmatpush3.bf16.msra.mxu1 %v988_v5  ;;  %1039 = vmatpush3.bf16.msra.mxu0 %v1036_v6 }
  0x41   :  { %993 = vmatprep.subr.bf16.mxu1 %v992_v18  ;;  %1041 = vmatprep.subr.bf16.mxu0 %v1040_v16 }
  0x42   :  { %940 = vmatprep.mubr.f32.mxu0 %v1228_v21  ;;  %874 = vmatprep.mubr.f32.mxu1 %v1228_v21 }
  0x44   :  { %995 = vmatpush3.bf16.msra.mxu1 %v992_v18  ;;  %1043 = vmatpush3.bf16.msra.mxu0 %v1040_v16 }
  0x45   :  { %997 = vmatprep.subr.bf16.mxu1 %v996_v32  ;;  %1045 = vmatprep.subr.bf16.mxu0 %v1044_v35 }
  0x48   :  { %999 = vmatpush3.bf16.msra.mxu1 %v996_v32  ;;  %1047 = vmatpush3.bf16.msra.mxu0 %v1044_v35 }
  0x49   :  { %1001 = vmatprep.subr.bf16.mxu1 %v1000_v36  ;;  %1049 = vmatprep.subr.bf16.mxu0 %v1222_v15 }
  0x4b   :  { %875 = vmatmul.mubr.f32.vlgmr.msra.gmra.mrb[0].mxu1 %v1247_v29  ;;  %941 = vmatmul.mubr.f32.vlgmr.msra.gmra.mrb[0].mxu0 %v1247_v29 }
  0x4c   :  { %1003 = vmatpush3.bf16.msra.mxu1 %v1000_v36  ;;  %1051 = vmatpush3.bf16.msra.mxu0 %v1222_v15  ;;  %v1012_v15 = vpack.c.bf16 %v1292_v63, %v1280_v56 }
  0x4d   :  { %1005 = vmatprep.subr.bf16.mxu1 %v1004_v38  ;;  %1053 = vmatprep.subr.bf16.mxu0 %v1225_v19 }
  0x4e   :  { %877 = vmatprep.mubr.f32.mxu1 %v1288_v61  ;;  %943 = vmatprep.mubr.f32.mxu0 %v1288_v61 }
  0x4f   :  { %878 = vmatmul.mubr.f32.gmra.mrb[2].mxu1 %v1295_v1  ;;  %944 = vmatmul.mubr.f32.gmra.mrb[2].mxu0 %v1295_v1 }
  0x50   :  { %1007 = vmatpush3.bf16.msra.mxu1 %v1004_v38  ;;  %1055 = vmatpush3.bf16.msra.mxu0 %v1225_v19  ;;  %v763_v19 = vld [vmem:[%s1364_s2] ss:$0 sm:$0xff]  ;;  %s1137_s2 = scalar_lea.vmem %s751_s12, 512 }
  0x51   :  { %1009 = vmatprep.subr.bf16.mxu1 %v1008_v22  ;;  %1057 = vmatprep.subr.bf16.mxu0 %v1234_v23  ;;  %p1138_p2 = scmp.ne.s32.totalorder %s751_s12, %s1137_s2  ;;  %p1143_p4 = scmp.lt.s32.totalorder %s1137_s2, %s1137_s2 }
  0x52   :  { %896 = vmatprep.mubr.f32.mxu1 %v1244_v27  ;;  %962 = vmatprep.mubr.f32.mxu0 %v1228_v21 }
  0x53   :  { %p1144_p5 = por %p1143_p4, %p1142_p3 }
  0x54   :  { %1011 = vmatpush3.bf16.msra.mxu1 %v1008_v22  ;;  %1059 = vmatpush3.bf16.msra.mxu0 %v1234_v23 }
  0x55   :  { %1013 = vmatprep.subr.bf16.mxu1 %v1012_v15  ;;  %1061 = vmatprep.subr.bf16.mxu0 %v1275_v47  ;;  %p1145_p6 = pnand %p1144_p5, %p1138_p2 }
  0x58   :  { %1015 = vmatpush3.bf16.msra.mxu1 %v1012_v15  ;;  %1063 = vmatpush3.bf16.msra.mxu0 %v1275_v47 }
  0x5b   :  { %897 = vmatmul.mubr.f32.vlgmr.msra.gmra.mrb[0].mxu1 %v1262_v37  ;;  %963 = vmatmul.mubr.f32.vlgmr.msra.gmra.mrb[0].mxu0 %v1247_v29 }
  0x5c   :  { %899 = vmatprep.mubr.f32.mxu1 %v1298_v3  ;;  %965 = vmatprep.mubr.f32.mxu0 %v1288_v61 }
  0x5f   :  { %900 = vmatmul.mubr.f32.gmra.mrb[2].mxu1 %v1304_v8  ;;  %966 = vmatmul.mubr.f32.gmra.mrb[2].mxu0 %v1295_v1 }
 0x12e   :  { %v898_v21 = vpop.f32.mrb[0].mxu1  ;;  %v964_v23 = vpop.f32.mrb[0].mxu0 }
 0x12f   :  { %v1064_v24 = vadd.f32 %v898_v21, %v763_v19  ;;  %v401_v26 = vpop.f32.mrb[1].mxu1  ;;  %v719_v27 = vpop.f32.mrb[1].mxu0 }
 0x130   :  { %v1066_v30 = vadd.f32 %v763_v19, %v401_v26 }
 0x131   :  { %v1065_v33 = vadd.f32 %v1064_v24, %v964_v23 }
 0x132   :  { %v1067_v29 = vadd.f32 %v1066_v30, %v719_v27  ;;  %v901_v34 = vpop.f32.mrb[2].mxu1  ;;  %v967_v37 = vpop.f32.mrb[2].mxu0 }
 0x133   :  { %742 = vst [vmem:[#allocation7 + $0x8] sm:$0xff] %v1065_v33  ;;  %v1068_v39 = vadd.f32 %v901_v34, %v763_v19  ;;  %v415_v40 = vpop.f32.mrb[3].mxu1  ;;  %v731_v41 = vpop.f32.mrb[3].mxu0 }
 0x134   :  { %741 = vst [vmem:[#allocation7] sm:$0xff] %v1067_v29  ;;  %v1070_v42 = vadd.f32 %v763_v19, %v415_v40 }
 0x135   :  { %v1069_v43 = vadd.f32 %v1068_v39, %v967_v37 }
 0x136   :  { %v1071_v44 = vadd.f32 %v1070_v42, %v731_v41 }
 0x137   :  { %744 = vst [vmem:[#allocation7 + $0x18] sm:$0xff] %v1069_v43 }
 0x138   :  { %743 = vst [vmem:[#allocation7 + $0x10] sm:$0xff] %v1071_v44 }
 0x139   :  { %1148 = shalt.err (!%p1145_p6)
}
 0x13a   :  { %s1149_s15 = scalar_lea.hbm %s1365_s3, 512 }
 0x13b   :  { %p1150_p7 = scmp.ne.s32.totalorder %s1365_s3, %s1149_s15  ;;  %p1153_p8 = scmp.lt.u32.totalorder %s1149_s15, %s1365_s3 }
 0x13d   :  { %p1155_p9 = pnand %p1153_p8, %p1150_p7 }
 0x13f   :  { %1158 = shalt.err (!%p1155_p9)
}
 0x140   :  { %756 = dma.vmem_to_hbm [thread:$0]  %s751_s12, 512, %s1365_s3, [#allocation4], %s1166_s22, %s1166_s22, %s1167_s23  }
 0x141   :  { %1163 = dma.done.wait [#allocation4], 512  }
 0x142   :  { %1164 = vsyncadd [#allocation4], 4294966784 }
 0x143   :  { %760 = vsyncpa [#allocation3], 1 }
 0x144   :  { %761 = vsyncpa [#allocation6], 1 }
 0x145   :  { %762 = vsyncpa [#allocation4], 1 }

</bundles_post_ra>
